<compile_context>
chip_gen: v7x
topology: tpu7x:2x2x1
jax: 0.10.0
libtpu: 0.0.40
codegen_flags: <defaults>
</compile_context>

<pallas_src>
import functools

import jax
import jax.numpy as jnp
from jax.experimental import pallas as pl
from jax.experimental.pallas import tpu as pltpu


def _round_up(x, m):
    return (x + m - 1) // m * m


# ---------------------------------------------------------------------------
# Kernel: masked-mean over T (tiled reduction) + linear head in the finalize.
#   lens_src_ref : train -> cap_lens [Bt, 1] int32 ; inference -> seqs [Bt, Tpad] int32
#   embeds_ref   : [Bt, Tt, D]  (bf16 or f32; upcast to f32 inside)
#   w_ref, b_ref : [D, Opad], [1, Opad] f32 (resident, constant index_map)
#   out_ref      : [Bt, Opad] f32
#   acc_ref      : VMEM f32 [Bt, D] accumulator scratch
#   len_ref      : VMEM int32 [Bt, 1] lens scratch (computed once at t == 0)
# ---------------------------------------------------------------------------
def _pool_kernel(lens_src_ref, embeds_ref, w_ref, b_ref, out_ref,
                 acc_ref, len_ref, *, mode, end_idx, t_tile):
    t = pl.program_id(1)

    @pl.when(t == 0)
    def _init():
        acc_ref[...] = jnp.zeros_like(acc_ref)
        if mode == "train":
            len_ref[...] = lens_src_ref[...] - 1
        else:
            # lens = count of non-end tokens in the (resident) seqs block.
            seqs = lens_src_ref[...]                                   # [Bt, Tpad]
            len_ref[...] = jnp.sum((seqs != end_idx).astype(jnp.int32),
                                   axis=1, keepdims=True)

    bt = acc_ref.shape[0]
    lens_i = len_ref[...]                                              # [Bt, 1] int32
    # Global time indices of this T tile -> prefix mask (t < lens).
    t_idx = jax.lax.broadcasted_iota(jnp.int32, (bt, t_tile), 1) + t * t_tile
    mask = (t_idx < lens_i).astype(jnp.float32)                        # [Bt, Tt]
    e = embeds_ref[...].astype(jnp.float32)                            # [Bt, Tt, D]
    acc_ref[...] += jnp.sum(e * mask[:, :, None], axis=1)              # [Bt, D]

    @pl.when(t == pl.num_programs(1) - 1)
    def _finalize():
        # max(lens, 1) guards padded rows / lens==0 (torch would produce NaN here).
        lens_f = jnp.maximum(len_ref[...].astype(jnp.float32), 1.0)
        inv = pl.reciprocal(lens_f, approx=True)                       # EUP, ~free
        mean = acc_ref[...] * inv                                      # [Bt, D]
        out_ref[...] = (jnp.dot(mean, w_ref[...],
                                preferred_element_type=jnp.float32)
                        + b_ref[...]).astype(out_ref.dtype)


# ---------------------------------------------------------------------------
# pallas_call wrapper: padding (lane-dense output, tile-aligned B/T) + grid.
# ---------------------------------------------------------------------------
def _pooled_linear(lens_src, embeds, w, b, *, mode, end_idx,
                   b_tile=8, t_tile=16):
    B, T, D = embeds.shape
    O = w.shape[1]

    B_pad = _round_up(B, b_tile)
    T_pad = _round_up(T, t_tile)
    O_pad = _round_up(O, 128)        # lane-dense output -> unmasked vst

    embeds_p = jnp.pad(embeds, ((0, B_pad - B), (0, T_pad - T), (0, 0)))
    w_p = jnp.pad(w.astype(jnp.float32), ((0, 0), (0, O_pad - O)))
    b_p = jnp.pad(b.astype(jnp.float32), ((0, 0), (0, O_pad - O)))

    if mode == "train":
        # padded rows get cap_lens=1 -> lens=0 -> guarded; sliced away anyway.
        lens_src_p = jnp.pad(lens_src, ((0, B_pad - B), (0, 0)), constant_values=1)
        ls_spec = pl.BlockSpec((b_tile, 1), lambda i, t: (i, 0))
    else:
        # padded positions/rows filled with end_idx so they never count.
        lens_src_p = jnp.pad(lens_src, ((0, B_pad - B), (0, T_pad - T)),
                             constant_values=end_idx)
        ls_spec = pl.BlockSpec((b_tile, T_pad), lambda i, t: (i, 0))

    grid = (B_pad // b_tile, T_pad // t_tile)

    out = pl.pallas_call(
        functools.partial(_pool_kernel, mode=mode, end_idx=end_idx, t_tile=t_tile),
        out_shape=jax.ShapeDtypeStruct((B_pad, O_pad), jnp.float32),
        grid_spec=pltpu.PrefetchScalarGridSpec(
            num_scalar_prefetch=0,
            grid=grid,
            in_specs=[
                ls_spec,                                                  # lens source
                pl.BlockSpec((b_tile, t_tile, D), lambda i, t: (i, t, 0)),  # embeds
                pl.BlockSpec((D, O_pad), lambda i, t: (0, 0)),            # w (resident)
                pl.BlockSpec((1, O_pad), lambda i, t: (0, 0)),            # b (resident)
            ],
            out_specs=pl.BlockSpec((b_tile, O_pad), lambda i, t: (i, 0)),
            scratch_shapes=[
                pltpu.VMEM((b_tile, D), jnp.float32),   # sum accumulator
                pltpu.VMEM((b_tile, 1), jnp.int32),     # lens per B-tile
            ],
        ),
        compiler_params=pltpu.CompilerParams(
            dimension_semantics=("parallel", "arbitrary"),
            vmem_limit_bytes=32 << 20,
        ),
    )(lens_src_p, embeds_p, w_p, b_p)

    return out[:B, :O]


# ---------------------------------------------------------------------------
# Glue mimicking CaptionSequenceModel.forward on the inner-model's output.
# ---------------------------------------------------------------------------
def caption_sequence_forward(input_dict, model_output, params, *, end_idx,
                             b_tile=8, t_tile=16):
    # TODO(synk): the inner `self.model(input_dict)` is an arbitrary captioning
    # model; its outputs are taken as inputs here instead of being re-implemented.
    output = dict(model_output)
    mode = input_dict["mode"]
    if mode == "train":
        cap_lens = input_dict["cap_lens"].reshape(-1, 1).astype(jnp.int32)
        seq_outputs = _pooled_linear(
            cap_lens, output["embeds"], params["w"], params["b"],
            mode="train", end_idx=end_idx, b_tile=b_tile, t_tile=t_tile)
    elif mode == "inference":
        if input_dict.get("sample_method", None) == "beam":
            return output
        seqs = output["seqs"].astype(jnp.int32)
        seq_outputs = _pooled_linear(
            seqs, output["embeds"], params["w"], params["b"],
            mode="inference", end_idx=end_idx, b_tile=b_tile, t_tile=t_tile)
    else:
        raise Exception("mode should be either 'train' or 'inference'")
    # Note: when d_model == seq_output_size the torch module uses the identity
    # transform; that case is handled by passing w = I, b = 0 (not exercised here).
    output["seq_outputs"] = seq_outputs
    return output


# ---------------------------------------------------------------------------
# Pure-JAX reference for verification (prefix-mask mean + linear).
# ---------------------------------------------------------------------------
def _ref(embeds_f32, lens, w, b):
    T = embeds_f32.shape[1]
    mask = (jnp.arange(T)[None, :] < lens[:, None]).astype(jnp.float32)
    denom = jnp.maximum(lens[:, None].astype(jnp.float32), 1.0)
    mean = jnp.sum(embeds_f32 * mask[:, :, None], axis=1) / denom
    return mean @ w + b


if __name__ == "__main__":
    # Small shapes: B=2, T=20, d_model=32, seq_output_size=16.
    B, T, D, O = 2, 20, 32, 16
    END_IDX = 0

    key = jax.random.PRNGKey(0)
    k_e, k_w, k_b, k_s = jax.random.split(key, 4)

    # embeds fed as bf16 (halves HBM traffic); kernel upcasts to f32 internally.
    embeds_bf16 = jax.random.normal(k_e, (B, T, D), dtype=jnp.float32).astype(jnp.bfloat16)
    embeds_f32 = embeds_bf16.astype(jnp.float32)

    params = {
        "w": jax.random.normal(k_w, (D, O), dtype=jnp.float32) * 0.02,
        "b": jax.random.normal(k_b, (1, O), dtype=jnp.float32) * 0.02,
    }

    # seqs with end_idx tokens in a contiguous tail -> inference lens == 13.
    seqs = jax.random.randint(k_s, (B, T), 1, 10, dtype=jnp.int32)
    seqs = seqs.at[:, 13:].set(END_IDX)
    cap_lens = jnp.array([14, 20], dtype=jnp.int32)

    model_output_train = {"embeds": embeds_bf16}
    model_output_infer = {"embeds": embeds_bf16, "seqs": seqs}

    # --- train mode ---
    out_train = caption_sequence_forward(
        {"mode": "train", "cap_lens": cap_lens},
        model_output_train, params, end_idx=END_IDX)
    jax.block_until_ready(out_train["seq_outputs"])
    ref_train = _ref(embeds_f32, (cap_lens - 1).astype(jnp.float32),
                     params["w"], params["b"])
    assert jnp.allclose(out_train["seq_outputs"], ref_train, atol=1e-3, rtol=1e-3)

    # --- inference mode ---
    out_infer = caption_sequence_forward(
        {"mode": "inference"},
        model_output_infer, params, end_idx=END_IDX)
    jax.block_until_ready(out_infer["seq_outputs"])
    lens_inf = jnp.sum((seqs != END_IDX).astype(jnp.float32), axis=1)
    ref_infer = _ref(embeds_f32, lens_inf, params["w"], params["b"])
    assert jnp.allclose(out_infer["seq_outputs"], ref_infer, atol=1e-3, rtol=1e-3)

    # --- inference with beam sampling: passthrough, no kernel call ---
    out_beam = caption_sequence_forward(
        {"mode": "inference", "sample_method": "beam"},
        model_output_infer, params, end_idx=END_IDX)
    assert "seq_outputs" not in out_beam

    print("KERNEL_OK")
</pallas_src>

<mosaic_0001>
module attributes {stable_mosaic.version = 11 : i64} {
  func.func @_pool_kernel(%arg0: i32, %arg1: i32, %arg2: memref<8x1xi32, #tpu.memory_space<vmem>>, %arg3: memref<8x16x32xbf16, #tpu.memory_space<vmem>>, %arg4: memref<32x128xf32, #tpu.memory_space<vmem>>, %arg5: memref<1x128xf32, #tpu.memory_space<vmem>>, %arg6: memref<8x128xf32, #tpu.memory_space<vmem>>, %arg7: memref<8x32xf32, #tpu.memory_space<vmem>>, %arg8: memref<8x1xi32, #tpu.memory_space<vmem>>) attributes {dimension_semantics = [#tpu.dimension_semantics<parallel>, #tpu.dimension_semantics<arbitrary>], iteration_bounds = array<i64: 1, 2>, scalar_prefetch = 0 : i64, scratch_operands = 2 : i64, tpu.core_type = #tpu.core_type<tc>, window_params = [{transform_indices = @transform_0, window_bounds = array<i64: 8, 1>}, {transform_indices = @transform_1, window_bounds = array<i64: 8, 16, 32>}, {pipeline_mode = #tpu.pipeline_mode<synchronous>, transform_indices = @transform_2, window_bounds = array<i64: 32, 128>}, {pipeline_mode = #tpu.pipeline_mode<synchronous>, transform_indices = @transform_3, window_bounds = array<i64: 1, 128>}, {transform_indices = @transform_4, window_bounds = array<i64: 8, 128>}]} {
    %c0_i32 = arith.constant 0 : i32
    %0 = arith.cmpi eq, %arg1, %c0_i32 : i32
    %1 = arith.extui %0 : i1 to i32
    %c0_i32_0 = arith.constant 0 : i32
    %2 = arith.cmpi ne, %1, %c0_i32_0 : i32
    scf.if %2 {
      %cst_10 = arith.constant 0.000000e+00 : f32
      %24 = vector.broadcast %cst_10 : f32 to vector<8x32xf32>
      %c0_11 = arith.constant 0 : index
      %c0_12 = arith.constant 0 : index
      %25 = vector.load %arg7[%c0_11, %c0_12] : memref<8x32xf32, #tpu.memory_space<vmem>>, vector<8x32xf32>
      tpu.vector_store %arg7[%c0_11, %c0_12], %24 {strides = array<i32>} : memref<8x32xf32, #tpu.memory_space<vmem>>, vector<8x32xf32>,
      %c0_13 = arith.constant 0 : index
      %c0_14 = arith.constant 0 : index
      %26 = vector.load %arg2[%c0_13, %c0_14] : memref<8x1xi32, #tpu.memory_space<vmem>>, vector<8x1xi32>
      %c1_i32_15 = arith.constant 1 : i32
      %27 = vector.broadcast %c1_i32_15 : i32 to vector<8x1xi32>
      %28 = arith.subi %26, %27 : vector<8x1xi32>
      %c0_16 = arith.constant 0 : index
      %c0_17 = arith.constant 0 : index
      %29 = vector.load %arg8[%c0_16, %c0_17] : memref<8x1xi32, #tpu.memory_space<vmem>>, vector<8x1xi32>
      tpu.vector_store %arg8[%c0_16, %c0_17], %28 {strides = array<i32>} : memref<8x1xi32, #tpu.memory_space<vmem>>, vector<8x1xi32>,
    } else {
    }
    %c0 = arith.constant 0 : index
    %c0_1 = arith.constant 0 : index
    %3 = vector.load %arg8[%c0, %c0_1] : memref<8x1xi32, #tpu.memory_space<vmem>>, vector<8x1xi32>
    %4 = tpu.iota {dimensions = array<i32: 1>} : vector<8x16xi32>
    %c16_i32 = arith.constant 16 : i32
    %5 = arith.muli %arg1, %c16_i32 : i32
    %6 = vector.broadcast %5 : i32 to vector<8x16xi32>
    %7 = arith.addi %4, %6 : vector<8x16xi32>
    %8 = vector.broadcast %3 : vector<8x1xi32> to vector<8x16xi32>
    %9 = arith.cmpi slt, %7, %8 : vector<8x16xi32>
    %10 = arith.extui %9 : vector<8x16xi1> to vector<8x16xi32>
    %11 = arith.sitofp %10 : vector<8x16xi32> to vector<8x16xf32>
    %c0_2 = arith.constant 0 : index
    %c0_3 = arith.constant 0 : index
    %c0_4 = arith.constant 0 : index
    %12 = vector.load %arg3[%c0_2, %c0_3, %c0_4] : memref<8x16x32xbf16, #tpu.memory_space<vmem>>, vector<8x16x32xbf16>
    %13 = arith.extf %12 : vector<8x16x32xbf16> to vector<8x16x32xf32>
    %c0_5 = arith.constant 0 : index
    %c0_6 = arith.constant 0 : index
    %14 = vector.load %arg7[%c0_5, %c0_6] : memref<8x32xf32, #tpu.memory_space<vmem>>, vector<8x32xf32>
    %15 = vector.shape_cast %11 : vector<8x16xf32> to vector<8x16x1xf32>
    %16 = vector.broadcast %15 : vector<8x16x1xf32> to vector<8x16x32xf32>
    %17 = arith.mulf %13, %16 : vector<8x16x32xf32>
    %cst = arith.constant dense<0.000000e+00> : vector<8x32xf32>
    %18 = vector.multi_reduction <add>, %17, %cst [1] : vector<8x16x32xf32> to vector<8x32xf32>
    %19 = arith.addf %14, %18 : vector<8x32xf32>
    %c0_7 = arith.constant 0 : index
    %c0_8 = arith.constant 0 : index
    %20 = vector.load %arg7[%c0_7, %c0_8] : memref<8x32xf32, #tpu.memory_space<vmem>>, vector<8x32xf32>
    tpu.vector_store %arg7[%c0_7, %c0_8], %19 {strides = array<i32>} : memref<8x32xf32, #tpu.memory_space<vmem>>, vector<8x32xf32>,
    %c1_i32 = arith.constant 1 : i32
    %21 = arith.cmpi eq, %arg1, %c1_i32 : i32
    %22 = arith.extui %21 : i1 to i32
    %c0_i32_9 = arith.constant 0 : i32
    %23 = arith.cmpi ne, %22, %c0_i32_9 : i32
    scf.if %23 {
      %c0_10 = arith.constant 0 : index
      %c0_11 = arith.constant 0 : index
      %24 = vector.load %arg8[%c0_10, %c0_11] : memref<8x1xi32, #tpu.memory_space<vmem>>, vector<8x1xi32>
      %25 = arith.sitofp %24 : vector<8x1xi32> to vector<8x1xf32>
      %cst_12 = arith.constant 1.000000e+00 : f32
      %26 = vector.broadcast %cst_12 : f32 to vector<8x1xf32>
      %27 = arith.maximumf %25, %26 : vector<8x1xf32>
      %28 = tpu.reciprocal %27 {approx = true} : vector<8x1xf32> -> vector<8x1xf32>
      %c0_13 = arith.constant 0 : index
      %c0_14 = arith.constant 0 : index
      %29 = vector.load %arg7[%c0_13, %c0_14] : memref<8x32xf32, #tpu.memory_space<vmem>>, vector<8x32xf32>
      %30 = vector.broadcast %28 : vector<8x1xf32> to vector<8x32xf32>
      %31 = arith.mulf %29, %30 : vector<8x32xf32>
      %c0_15 = arith.constant 0 : index
      %c0_16 = arith.constant 0 : index
      %32 = vector.load %arg4[%c0_15, %c0_16] : memref<32x128xf32, #tpu.memory_space<vmem>>, vector<32x128xf32>
      %cst_17 = arith.constant dense<0.000000e+00> : vector<8x128xf32>
      %33 = tpu.matmul %31, %32, %cst_17 {dimension_numbers = #tpu.dot_dimension_numbers<[1], [0], [0], [1], [0, 0, 1, 1], [], []>} : vector<8x32xf32>, vector<32x128xf32>, vector<8x128xf32> -> vector<8x128xf32>
      %c0_18 = arith.constant 0 : index
      %c0_19 = arith.constant 0 : index
      %34 = vector.load %arg5[%c0_18, %c0_19] : memref<1x128xf32, #tpu.memory_space<vmem>>, vector<1x128xf32>
      %35 = vector.broadcast %34 : vector<1x128xf32> to vector<8x128xf32>
      %36 = arith.addf %33, %35 : vector<8x128xf32>
      %c0_20 = arith.constant 0 : index
      %c0_21 = arith.constant 0 : index
      %37 = vector.load %arg6[%c0_20, %c0_21] : memref<8x128xf32, #tpu.memory_space<vmem>>, vector<8x128xf32>
      tpu.vector_store %arg6[%c0_20, %c0_21], %36 {strides = array<i32>} : memref<8x128xf32, #tpu.memory_space<vmem>>, vector<8x128xf32>,
    } else {
    }
    return
  }
  func.func @transform_0(%arg0: i32, %arg1: i32) -> (i32, i32) {
    %c0_i32 = arith.constant 0 : i32
    %c0_i32_0 = arith.constant 0 : i32
    return %arg0, %c0_i32 : i32, i32
  }
  func.func @transform_1(%arg0: i32, %arg1: i32) -> (i32, i32, i32) {
    %c0_i32 = arith.constant 0 : i32
    %c0_i32_0 = arith.constant 0 : i32
    return %arg0, %arg1, %c0_i32 : i32, i32, i32
  }
  func.func @transform_2(%arg0: i32, %arg1: i32) -> (i32, i32) {
    %c0_i32 = arith.constant 0 : i32
    %c0_i32_0 = arith.constant 0 : i32
    %c0_i32_1 = arith.constant 0 : i32
    return %c0_i32, %c0_i32_0 : i32, i32
  }
  func.func @transform_3(%arg0: i32, %arg1: i32) -> (i32, i32) {
    %c0_i32 = arith.constant 0 : i32
    %c0_i32_0 = arith.constant 0 : i32
    %c0_i32_1 = arith.constant 0 : i32
    return %c0_i32, %c0_i32_0 : i32, i32
  }
  func.func @transform_4(%arg0: i32, %arg1: i32) -> (i32, i32) {
    %c0_i32 = arith.constant 0 : i32
    %c0_i32_0 = arith.constant 0 : i32
    return %arg0, %c0_i32 : i32, i32
  }
}

</mosaic_0001>

<bundles_post_ra>
// kernel: tpu_custom_call.1
= control target key start
LH: loop header
LB: loop body
LE: loop exit
PB: predicated region body
PF: predicated region fallthrough
CT: control target
= control target key end

     0   :  { %9 = vsyncpa [#allocation5], 0  ;;  %s1280_s0 = inlined_call_operand.vmem [shape: s32[8,1], index: 0, kind: input, shape index: {}]   ;;  %s1281_s1 = inlined_call_operand.hbm [shape: bf16[8,32,32], index: 1, kind: input, shape index: {}]   ;;  %s1282_s2 = inlined_call_operand.hbm [shape: f32[32,128], index: 2, kind: input, shape index: {}]   ;;  %s1283_s3 = inlined_call_operand.vmem [shape: f32[1,128], index: 3, kind: input, shape index: {}]   ;;  %s1284_s4 = inlined_call_operand.hbm [shape: f32[8,128], index: 4, kind: output, shape index: {}]  }
   0x1   :  { %11 = vsyncpa [#allocation5 + $0x1], 0 }
   0x2   :  { %12 = vsyncpa [#allocation8], 0 }
   0x3   :  { %13 = vsyncpa [#allocation6], 0  ;;  %s1076_s15 = smov 0   ;;  %s1078_s16 = smov 0  }
   0x4   :  { %s1080_s17 = smov 0   ;;  %s1082_s18 = smov 0  }
   0x5   :  { %s1084_s19 = smov 0   ;;  %s1086_s20 = smov 0  }
   0x6 LB: > { %s740_s21 = sadd.s32 4294967295, %s1032_s20   ;;  %s28_s22 = sadd.s32 1, %s1028_s19  ;;  %s1032_s20 = sphi %s1086_s20, %s19_s20   ;;  %s1028_s19 = sphi %s1084_s19, %s1304_s19   ;;  %s1024_s18 = sphi %s1082_s18, %s1303_s18   ;;  %s1020_s17 = sphi %s1080_s17, %s1302_s17   ;;  %s1016_s16 = sphi %s1078_s16, %s1301_s16   ;;  %s1012_s15 = sphi %s1076_s15, %s1300_s15  }
   0x7   : > { %p29_p0 = scmp.ge.s32.totalorder %s28_s22, 2  ;;  %s66_s23 = sadd.s32 1, %s1020_s17 }
   0x8   : > { %p73_p1 = scmp.ne.s32.totalorder %s1020_s17, %s1016_s16  ;;  %p74_p2 = scmp.eq.s32.totalorder %s1032_s20, 0 }
   0x9   : > { %s1306_s22 = smov (%p29_p0, %s28_s22), 0  ;;  %p79_p4 = scmp.ne.s32.totalorder %s1016_s16, %s1012_s15 }
   0xa   : > { %p1112_p3 = por %p74_p2, %p73_p1  ;;  %s62_s25 = ssub.s32 %s1028_s19, %s1306_s22 }
   0xb   : > { %p1121_p5 = scmp.eq.s32.totalorder %s740_s21, 0  ;;  %p64_p6 = scmp.eq.s32.totalorder %s62_s25, 0 }
   0xc   : > { %s1290_s24 = scalar_select %p1112_p3, 1, 0 }
   0xd   : > { %s1291_s26 = scalar_select %p1121_p5, 1, 0 }
   0xe   : > { %p741_p7 = scmp.ge.s32.totalorder %s1032_s20, 1  ;;  %p1128_p8 = por %p1121_p5, %p79_p4 }
   0xf   : > { %p158_p9 = scmp.lt.s32.totalorder %s1032_s20, 3  ;;  %s1034_s30 = smov [#allocation7]  }
  0x10   : > { %s1292_s27 = scalar_select %p1128_p8, 1, 0 }
  0x11   : > { %s1134_s28 = scalar_select %p64_p6, %s1020_s17, %s66_s23  }
  0x12   : > { %p1136_p10 = pnand %p741_p7, %p158_p9  ;;  %s177_s5 = sshll.u32 %s1034_s30, 4  ;;  %s178_s5 = int_to_ptr.vmem [resolvable:$true] %s177_s5 }
  0x13   : > { %s920_s9 = scalar_lea.hbm %s1282_s2, 512 }
  0x14   : > { %s1293_s29 = scalar_select %p1136_p10, 1, 0 }
  0x15   : > { %p843_p11 = pneg %p1136_p10  ;;  %p921_p13 = scmp.ne.s32.totalorder %s1282_s2, %s920_s9 }
  0x16   : > { %p927_p4 = scmp.lt.u32.totalorder %s920_s9, %s1282_s2 }
  0x17   : > { %p1144_p12 = pnand %p843_p11, %p1121_p5 }
  0x19   : > { %p922_p0 = pneg %p1144_p12 }
  0x1b   : > { %p923_p1 = pnand %p922_p0, %p921_p13 }
  0x1d   : > { %p924_p2 = pneg %p923_p1 }
  0x1f   : > { %p929_p6 = pnand %p927_p4, %p924_p2 }
  0x21   : > { %932 = shalt.err (!%p929_p6)
}
  0x22   : > { %s933_s14 = scalar_lea.vmem %s178_s5, 512  ;;  %p941_p5 = scmp.lt.s32.totalorder %s178_s5, %s178_s5 }
  0x23   : > { %p934_p7 = scmp.ne.s32.totalorder %s178_s5, %s933_s14  ;;  %p942_p8 = scmp.lt.s32.totalorder %s933_s14, %s933_s14 }
  0x25   : > { %p936_p9 = pnand %p934_p7, %p922_p0  ;;  %p943_p10 = por %p942_p8, %p941_p5 }
  0x27   : > { %p937_p11 = pneg %p936_p9 }
  0x29   : > { %p944_p3 = pnand %p943_p10, %p937_p11 }
  0x2b   : > { %947 = shalt.err (!%p944_p3)
}
  0x2c   : > { %s1035_s15 = smov 128   ;;  %s1036_s23 = smov 8  }
  0x2d   : > { %846 = dma.hbm_to_vmem [thread:$0]  (!%p1144_p12), %s1282_s2, 512, %s178_s5, [#allocation8], %s1035_s15, %s1035_s15, %s1036_s23  }
  0x2e   : > { %p744_p13 = scmp.ge.s32.totalorder %s1032_s20, 2 }
  0x30   : > { %190 = sbr.rel (%p744_p13) target bundleno = 70 (0x46), region = 28 }
  0x37   : > { %s194_s7 = sand.u32 1, %s1020_s17   ;;  %s764_s8 = sshll.u32 %s1028_s19, 7 }
  0x38   : > { %s745_s9 = sshll.u32 %s194_s7, 6  ;;  %s207_s11 = scalar_lea.hbm %s1281_s1, %s764_s8 }
  0x39   : > { %p1295_p3 = scmp.ne.s32.totalorder %s1290_s24, 0  ;;  %s198_s12 = scalar_lea.vmem [#allocation4], %s745_s9 }
  0x3a   : > { %s220_s13 = sshll.u32 %s198_s12, 4  ;;  %s1037_s15 = smov 256   ;;  %s221_s13 = int_to_ptr.vmem [resolvable:$true] %s220_s13 }
  0x3b   : > { %s828_s5 = scalar_select %p1295_p3, [#allocation0], [#allocation12] }
  0x3c   : > { %829 = sst [smem:[#allocation11]] (%p1295_p3), %s1037_s15  ;;  %s1038_s23 = smov 128  }
  0x3d   : > { %s212_s14 = sld [smem:[%s828_s5]]   ;;  %s1039_s25 = smov 2  }
  0x3e   : > { %830 = sst [smem:[#allocation11 + $0x1]] (%p1295_p3), %s1038_s23  ;;  %s1040_s30 = smov 64  }
  0x3f   : > { %831 = sst [smem:[#allocation11 + $0x2]] (%p1295_p3), %s1039_s25  ;;  %s1041_s9 = smov 4  }
  0x40   : > { %832 = sst [smem:[#allocation11 + $0x3]] (%p1295_p3), %s1040_s30  ;;  %s195_s6 = scalar_lea.sflag [#allocation5], %s194_s7 }
  0x41   : > { %833 = sst [smem:[#allocation11 + $0x4]] (%p1295_p3), %s1040_s30  ;;  %s1042_s5 = smov [#allocation10]  }
  0x42   : > { %834 = sst [smem:[#allocation11 + $0x5]] (%p1295_p3), %s1041_s9 }
  0x43   : > { %s748_s8 = sshll.u32 %s212_s14, 26 }
  0x44   : > { %s749_s10 = sadd.s32 134217728, %s748_s8 }
  0x45   : > { %835 = dma.general (%p1295_p3), %s207_s11, 1024, %s221_s13, %s195_s6, %s1042_s5, [#allocation11], %s749_s10, 0  }
  0x46 PF: > { %p1296_p5 = scmp.ne.s32.totalorder %s1293_s29, 0 }
  0x47   : > { %s247_s12 = sand.u32 (!%p1296_p5), 1, %s1016_s16   ;;  %p1297_p8 = scmp.ne.s32.totalorder (!%p1296_p5), %s1292_s27, 0 }
  0x48   : > { %245 = sbr.rel (%p1296_p5) target bundleno = 755 (0x2f3), region = 36  ;;  %s751_s15 = sshll.u32 (!%p1296_p5), %s247_s12, 6 }
  0x49   : > { %s248_s23 = scalar_lea.sflag (!%p1296_p5), [#allocation5], %s247_s12  ;;  %s1189_s25 = scalar_lea.vmem (!%p1296_p5), [#allocation4], %s751_s15 }
  0x4f   : > { %999 = dma.done.wait (%p1297_p8), %s248_s23, 1024  }
  0x50   : > { %1001 = vsyncadd (%p1297_p8), %s248_s23, 4294966272  ;;  %p1298_p10 = scmp.ne.s32.totalorder %s1291_s26, 0 }
  0x52   : > { %1003 = dma.done.wait (%p1298_p10), [#allocation8], 512  }
  0x53   : > { %1005 = vsyncadd (%p1298_p10), [#allocation8], 4294966784  ;;  %p753_p12 = scmp.ne.s32.totalorder %s1024_s18, 0 }
  0x54   : > { %vm289_vm0 = vcmask (!%p753_p12), 261120   ;;  %v291_v0 = vld [vmem:[%s1280_s0] sm:$0xff] (!%p753_p12)  ;;  %vm293_vm1 = vcmask (!%p753_p12), 7168   ;;  %v1043_v1 = vmov (!%p753_p12), 0.0  }
  0x55   : > { %288 = sbr.rel (%p753_p12) target bundleno = 92 (0x5c), region = 48  ;;  %290 = vst.msk [vmem:[#allocation2] sm:$0xff] (!%p753_p12), %vm289_vm0, %v1043_v1  ;;  %v754_v2 = vadd.s32 (!%p753_p12), 4294967295, %v291_v0 }
  0x57   : > { %294 = vst.msk [vmem:[#allocation3] sm:$0xff] (!%p753_p12), %vm293_vm1, %v754_v2 }
  0x5c PF: > { %v1044_v4 = vmov 0   ;;  %v296_v5 = vlaneseq  ;;  %s755_s26 = sshll.u32 %s1024_s18, 4  ;;  %v1045_v12 = vmov 0.0   ;;  %v797_v29 = vld [vmem:[%s1189_s25 + $0x8] sm:$0xff]   ;;  %v766_v30 = vld [vmem:[%s1189_s25] sm:$0xff]   ;;  %v798_v35 = vld [vmem:[%s1189_s25 + $0x10] sm:$0xff]  }
  0x5d   : > { %916 = vset.pattern.permute.xlu0 %v1044_v4  ;;  %v299_v7 = vstv %s755_s26  ;;  %v771_v33 = vunpack.c.l.bf16 %v797_v29  ;;  %v772_v34 = vunpack.c.h.bf16 %v797_v29  ;;  %v768_v36 = vunpack.c.h.bf16 %v766_v30  ;;  %v799_v44 = vld [vmem:[%s1189_s25 + $0x18] sm:$0xff]   ;;  %v800_v55 = vld [vmem:[%s1189_s25 + $0x20] sm:$0xff]   ;;  %v801_v4 = vld [vmem:[%s1189_s25 + $0x28] sm:$0xff]   ;;  %p757_p0 = scmp.ne.s32.totalorder %s1024_s18, 1 }
  0x5e   : > { %v295_v3 = vld [vmem:[#allocation3] sm:$0xff]  ;;  %v297_v6 = vand.u32 127, %v296_v5  ;;  %v341_v8 = vshrl.u32 %v296_v5, 7  ;;  %v767_v37 = vunpack.c.l.bf16 %v766_v30  ;;  %v775_v42 = vunpack.c.l.bf16 %v798_v35 }
  0x5f   : > { %302 = vperm.xlu0 %916, %v295_v3   ;;  %v776_v43 = vunpack.c.h.bf16 %v798_v35  ;;  %vm444_vm3 = vcmask 261120   ;;  %v779_v49 = vunpack.c.l.bf16 %v799_v44  ;;  %v780_v50 = vunpack.c.h.bf16 %v799_v44 }
  0x60   : > { %v300_v9 = vadd.s32 %v299_v7, %v297_v6  ;;  %v342_v10 = vsub.s32 0, %v341_v8  ;;  %v353_v15 = vsub.s32 1, %v341_v8  ;;  %v364_v17 = vsub.s32 2, %v341_v8 }
  0x61   : > { %v375_v19 = vsub.s32 3, %v341_v8  ;;  %v386_v21 = vsub.s32 4, %v341_v8  ;;  %v397_v23 = vsub.s32 5, %v341_v8  ;;  %v408_v25 = vsub.s32 6, %v341_v8 }
  0x62   : > { %v419_v27 = vsub.s32 7, %v341_v8  ;;  %v783_v63 = vunpack.c.l.bf16 %v800_v55  ;;  %v784_v3 = vunpack.c.h.bf16 %v800_v55  ;;  %vm525_vm4 = vcmask 1041409  }
  0x63   : > { %vm527_vm5 = vcmask 1042434   ;;  %vm529_vm6 = vcmask 1043459   ;;  %vm531_vm7 = vcmask 1044484   ;;  %vm533_vm8 = vcmask 1045509  }
  0x64   : > { %vm535_vm9 = vcmask 1046534   ;;  %vm537_vm10 = vcmask 1047559   ;;  %vm1048_vm11 = vmmov (!%p757_p0), 0  }
  0xde   : > { %v303_v11 = vpop.permute.xlu0 %302 }
  0xdf   : > { %vm304_vm2 = vcmp.lt.s32.totalorder %v300_v9, %v303_v11 }
  0xe0   : > { %v756_v13 = vsel %vm304_vm2, 1.0, %v1045_v12  ;;  %v787_v12 = vunpack.c.l.bf16 %v801_v4 }
  0xe1   : > { %v343_v14 = vrot.slane %v756_v13, %v342_v10  ;;  %v354_v16 = vrot.slane %v756_v13, %v353_v15  ;;  %v365_v18 = vrot.slane %v756_v13, %v364_v17  ;;  %v376_v20 = vrot.slane %v756_v13, %v375_v19  ;;  %v802_v17 = vld [vmem:[%s1189_s25 + $0x30] sm:$0xff]  }
  0xe2   : > { %v387_v22 = vrot.slane %v756_v13, %v386_v21  ;;  %v398_v24 = vrot.slane %v756_v13, %v397_v23  ;;  %v409_v26 = vrot.slane %v756_v13, %v408_v25  ;;  %v420_v28 = vrot.slane %v756_v13, %v419_v27 }
  0xe3   : > { %349 = vbcast.lane.b32.xlu1 %v343_v14, 264  ;;  %345 = vbcast.lane.b32.xlu0 %v343_v14, 256  ;;  %v792_v30 = vunpack.c.h.bf16 %v802_v17 }
  0xe7   : > { %356 = vbcast.lane.b32.xlu1 %v354_v16, 256  ;;  %360 = vbcast.lane.b32.xlu0 %v354_v16, 264  ;;  %v788_v16 = vunpack.c.h.bf16 %v801_v4 }
  0xeb   : > { %367 = vbcast.lane.b32.xlu1 %v365_v18, 256  ;;  %371 = vbcast.lane.b32.xlu0 %v365_v18, 264 }
  0xef   : > { %378 = vbcast.lane.b32.xlu1 %v376_v20, 256  ;;  %382 = vbcast.lane.b32.xlu0 %v376_v20, 264 }
  0xf3   : > { %389 = vbcast.lane.b32.xlu1 %v387_v22, 256  ;;  %393 = vbcast.lane.b32.xlu0 %v387_v22, 264 }
  0xf7   : > { %400 = vbcast.lane.b32.xlu1 %v398_v24, 256  ;;  %404 = vbcast.lane.b32.xlu0 %v398_v24, 264 }
  0xfb   : > { %411 = vbcast.lane.b32.xlu1 %v409_v26, 256  ;;  %415 = vbcast.lane.b32.xlu0 %v409_v26, 264  ;;  %v791_v26 = vunpack.c.l.bf16 %v802_v17 }
  0xff   : > { %422 = vbcast.lane.b32.xlu1 %v420_v28, 256  ;;  %426 = vbcast.lane.b32.xlu0 %v420_v28, 264 }
 0x155   : > { %v350_v31 = vpop.permute.xlu1 %349  ;;  %v346_v32 = vpop.permute.xlu0 %345 }
 0x156   : > { %v429_v45 = vmul.f32 %v768_v36, %v350_v31  ;;  %v428_v46 = vmul.f32 %v767_v37, %v346_v32  ;;  %v803_v31 = vld [vmem:[%s1189_s25 + $0x38] sm:$0xff]  }
 0x158   : > { %v446_v56 = vsel %vm444_vm3, %v429_v45, 0.0  ;;  %v445_v57 = vsel %vm444_vm3, %v428_v46, 0.0  ;;  %v796_v46 = vunpack.c.h.bf16 %v803_v31 }
 0x159   : > { %v357_v38 = vpop.permute.xlu1 %356  ;;  %v361_v39 = vpop.permute.xlu0 %360  ;;  %v447_v5 = vadd.f32 %v446_v56, %v445_v57 }
 0x15a   : > { %v430_v40 = vmul.f32 %v771_v33, %v357_v38  ;;  %v431_v41 = vmul.f32 %v772_v34, %v361_v39 }
 0x15b   : > { %v448_v18 = vrot.slane %v447_v5, 4 }
 0x15c   : > { %v454_v51 = vsel %vm444_vm3, %v430_v40, 0.0  ;;  %v455_v52 = vsel %vm444_vm3, %v431_v41, 0.0 }
 0x15d   : > { %v368_v47 = vpop.permute.xlu1 %367  ;;  %v372_v48 = vpop.permute.xlu0 %371  ;;  %v456_v60 = vadd.f32 %v455_v52, %v454_v51  ;;  %v449_v32 = vadd.f32 %v448_v18, %v447_v5 }
 0x15e   : > { %v432_v53 = vmul.f32 %v775_v42, %v368_v47  ;;  %v433_v54 = vmul.f32 %v776_v43, %v372_v48  ;;  %v795_v42 = vunpack.c.l.bf16 %v803_v31 }
 0x15f   : > { %v457_v8 = vrot.slane %v456_v60, 4  ;;  %v450_v47 = vrot.slane %v449_v32, 2 }
 0x160   : > { %v463_v58 = vsel %vm444_vm3, %v432_v53, 0.0  ;;  %v464_v59 = vsel %vm444_vm3, %v433_v54, 0.0 }
 0x161   : > { %v379_v61 = vpop.permute.xlu1 %378  ;;  %v383_v62 = vpop.permute.xlu0 %382  ;;  %v465_v0 = vadd.f32 %v464_v59, %v463_v58  ;;  %v458_v22 = vadd.f32 %v457_v8, %v456_v60 }
 0x162   : > { %v434_v1 = vmul.f32 %v779_v49, %v379_v61  ;;  %v435_v2 = vmul.f32 %v780_v50, %v383_v62  ;;  %v451_v61 = vadd.f32 %v450_v47, %v449_v32 }
 0x163   : > { %v466_v13 = vrot.slane %v465_v0, 4  ;;  %v459_v37 = vrot.slane %v458_v22, 2 }
 0x164   : > { %v472_v6 = vsel %vm444_vm3, %v434_v1, 0.0  ;;  %v473_v7 = vsel %vm444_vm3, %v435_v2, 0.0 }
 0x165   : > { %v474_v9 = vadd.f32 %v473_v7, %v472_v6  ;;  %v390_v10 = vpop.permute.xlu1 %389  ;;  %v394_v11 = vpop.permute.xlu0 %393  ;;  %v467_v27 = vadd.f32 %v466_v13, %v465_v0  ;;  %v460_v53 = vadd.f32 %v459_v37, %v458_v22 }
 0x166   : > { %v436_v14 = vmul.f32 %v783_v63, %v390_v10  ;;  %v437_v15 = vmul.f32 %v784_v3, %v394_v11 }
 0x167   : > { %v475_v19 = vrot.slane %v474_v9, 4  ;;  %v468_v43 = vrot.slane %v467_v27, 2  ;;  %v461_v4 = vrot.slane %v460_v53, 1 }
 0x168   : > { %v481_v20 = vsel %vm444_vm3, %v436_v14, 0.0  ;;  %v482_v21 = vsel %vm444_vm3, %v437_v15, 0.0 }
 0x169   : > { %v483_v23 = vadd.f32 %v482_v21, %v481_v20  ;;  %v401_v24 = vpop.permute.xlu1 %400  ;;  %v405_v25 = vpop.permute.xlu0 %404  ;;  %v476_v33 = vadd.f32 %v475_v19, %v474_v9  ;;  %v469_v58 = vadd.f32 %v468_v43, %v467_v27  ;;  %v452_v9 = vrot.slane %v451_v61, 1 }
 0x16a   : > { %v438_v28 = vmul.f32 %v787_v12, %v401_v24  ;;  %v439_v29 = vmul.f32 %v788_v16, %v405_v25  ;;  %v462_v14 = vadd.f32 %v461_v4, %v460_v53  ;;  %v1047_v43 = vmov (!%p757_p0), 0.0|0.0  }
 0x16b   : > { %v484_v34 = vrot.slane %v483_v23, 4  ;;  %v477_v48 = vrot.slane %v476_v33, 2  ;;  %v470_v8 = vrot.slane %v469_v58, 1  ;;  %v453_v19 = vadd.f32 %v452_v9, %v451_v61  ;;  %820 = vmatprep.subr.bf16.mxu0 (!%p757_p0), %v1047_v43 }
 0x16c   : > { %v490_v35 = vsel %vm444_vm3, %v438_v28, 0.0  ;;  %v491_v36 = vsel %vm444_vm3, %v439_v29, 0.0 }
 0x16d   : > { %v485_v38 = vadd.f32 %v484_v34, %v483_v23  ;;  %v492_v39 = vadd.f32 %v491_v36, %v490_v35  ;;  %v412_v40 = vpop.permute.xlu1 %411  ;;  %v416_v41 = vpop.permute.xlu0 %415  ;;  %v478_v62 = vadd.f32 %v477_v48, %v476_v33  ;;  %v471_v18 = vadd.f32 %v470_v8, %v469_v58  ;;  %v339_v33 = vld [vmem:[#allocation2] sm:$0xff] }
 0x16e   : > { %v440_v44 = vmul.f32 %v791_v26, %v412_v40  ;;  %v441_v45 = vmul.f32 %v792_v30, %v416_v41  ;;  %v526_v24 = vsel %vm525_vm4, %v462_v14, %v453_v19  ;;  %v558_v40 = vld [vmem:[#allocation7 + $0x8] sm:$0xff] (!%p757_p0)  ;;  %v1046_v41 = vmov (!%p757_p0), 0  }
 0x16f   : > { %v493_v49 = vrot.slane %v492_v39, 4  ;;  %v486_v50 = vrot.slane %v485_v38, 2  ;;  %v479_v10 = vrot.slane %v478_v62, 1  ;;  %v528_v27 = vsel %vm527_vm5, %v471_v18, %v526_v24  ;;  %917 = vset.pattern.permute.xlu0 (!%p757_p0), %v1046_v41 }
 0x170   : > { %v499_v51 = vsel %vm444_vm3, %v440_v44, 0.0  ;;  %v500_v52 = vsel %vm444_vm3, %v441_v45, 0.0  ;;  %v559_v45 = vld [vmem:[#allocation7 + $0x10] sm:$0xff] (!%p757_p0) }
 0x171   : > { %v494_v54 = vadd.f32 %v493_v49, %v492_v39  ;;  %v501_v55 = vadd.f32 %v500_v52, %v499_v51  ;;  %v423_v56 = vpop.permute.xlu1 %422  ;;  %v427_v57 = vpop.permute.xlu0 %426  ;;  %v487_v1 = vadd.f32 %v486_v50, %v485_v38  ;;  %v480_v20 = vadd.f32 %v479_v10, %v478_v62  ;;  %v546_v38 = vld [vmem:[#allocation3] sm:$0xff] (!%p757_p0)  ;;  %v557_v39 = vld [vmem:[#allocation7] sm:$0xff] (!%p757_p0) }
 0x172   : > { %v442_v59 = vmul.f32 %v795_v42, %v423_v56  ;;  %v443_v60 = vmul.f32 %v796_v46, %v427_v57  ;;  %v547_v42 = vcvt.s32.f32 (!%p757_p0), %v546_v38  ;;  %v821_v44 = vpack.c.bf16 (!%p757_p0), %v558_v40, %v557_v39  ;;  %v560_v46 = vld [vmem:[#allocation7 + $0x18] sm:$0xff] (!%p757_p0) }
 0x173   : > { %v495_v63 = vrot.slane %v494_v54, 2  ;;  %v502_v0 = vrot.slane %v501_v55, 4  ;;  %v488_v13 = vrot.slane %v487_v1, 1  ;;  %v530_v29 = vsel %vm529_vm6, %v480_v20, %v528_v27 }
 0x174   : > { %v508_v2 = vsel %vm444_vm3, %v442_v59, 0.0  ;;  %v509_v3 = vsel %vm444_vm3, %v443_v60, 0.0  ;;  %v548_v47 = vmax.f32 (!%p757_p0), %v547_v42, 1.0  ;;  %822 = vmatpush3.bf16.msra.mxu0 (!%p757_p0), %v821_v44  ;;  %v824_v48 = vpack.c.bf16 (!%p757_p0), %v560_v46, %v559_v45 }
 0x175   : > { %v496_v5 = vadd.f32 %v495_v63, %v494_v54  ;;  %v503_v6 = vadd.f32 %v502_v0, %v501_v55  ;;  %v510_v7 = vadd.f32 %v509_v3, %v508_v2  ;;  %v489_v23 = vadd.f32 %v488_v13, %v487_v1  ;;  %823 = vmatprep.subr.bf16.mxu0 (!%p757_p0), %v1047_v43  ;;  %v758_v54 = vld [vmem:[%s1283_s3] ss:$0 sm:$0xff] (!%p757_p0) }
 0x176   : > { %918 = vrcp.f32 (!%p757_p0), %v548_v47  ;;  %v1049_v50 = vmov (!%p757_p0), 0.0  }
 0x177   : > { %v504_v11 = vrot.slane %v503_v6, 2  ;;  %v511_v12 = vrot.slane %v510_v7, 4  ;;  %v497_v15 = vrot.slane %v496_v5, 1  ;;  %v532_v31 = vsel %vm531_vm7, %v489_v23, %v530_v29  ;;  %817 = vmatprep.mubr.msk.f32.mxu0 (!%p757_p0), %vm1048_vm11, %v1049_v50 }
 0x178   : > { %825 = vmatpush3.bf16.msra.mxu0 (!%p757_p0), %v824_v48 }
 0x179   : > { %v505_v16 = vadd.f32 %v504_v11, %v503_v6  ;;  %v512_v17 = vadd.f32 %v511_v12, %v510_v7  ;;  %v498_v25 = vadd.f32 %v497_v15, %v496_v5 }
 0x17b   : > { %v506_v21 = vrot.slane %v505_v16, 1  ;;  %v513_v22 = vrot.slane %v512_v17, 2  ;;  %v534_v32 = vsel %vm533_vm8, %v498_v25, %v532_v31 }
 0x17d   : > { %v514_v26 = vadd.f32 %v513_v22, %v512_v17  ;;  %v507_v28 = vadd.f32 %v506_v21, %v505_v16 }
 0x17f   : > { %v515_v30 = vrot.slane %v514_v26, 1  ;;  %v536_v35 = vsel %vm535_vm9, %v507_v28, %v534_v32 }
 0x180   : > { %545 = sbr.rel (%p757_p0) target bundleno = 730 (0x2da), region = 52  ;;  %v919_v49 = vpop.eup (!%p757_p0), %918 }
 0x181   : > { %v516_v34 = vadd.f32 %v515_v30, %v514_v26  ;;  %553 = vperm.xlu0 (!%p757_p0), %917, %v919_v49  }
 0x183   : > { %v538_v36 = vsel %vm537_vm10, %v516_v34, %v536_v35 }
 0x184   : > { %v540_v37 = vadd.f32 %v538_v36, %v339_v33 }
 0x186   : > { %541 = vst.msk [vmem:[#allocation2] sm:$0xff] %vm444_vm3, %v540_v37 }
 0x18d   : > { %v550_v51 = vld [vmem:[#allocation2] sm:$0xff] }
 0x200   : > { %v554_v52 = vpop.permute.xlu0 %553 }
 0x201   : > { %v556_v53 = vmul.f32 %v554_v52, %v550_v51 }
 0x203   : > { %818 = vmatmul.mubr.msk.f32.vlgmr.msra.gmra.mrb[0].mxu0 %vm444_vm3, %v556_v53 }
 0x2d6   : > { %v637_v55 = vpop.f32.mrb[0].mxu0 }
 0x2d7   : > { %v638_v56 = vadd.f32 %v758_v54, %v637_v55  ;;  %v819_v57 = vpop.f32.mrb[1].mxu0 }
 0x2d9   : > { %641 = vst [vmem:[#allocation9] sm:$0xff] %v638_v56 }
 0x2da PF: > { %p1236_p1 = scmp.eq.s32.totalorder %s740_s21, 1  ;;  %s1050_s11 = smov [#allocation9]  }
 0x2db   : > { %s651_s13 = sshll.u32 %s1050_s11, 4  ;;  %s652_s13 = int_to_ptr.vmem [resolvable:$true] %s651_s13 }
 0x2dc   : > { %s948_s14 = scalar_lea.vmem %s652_s13, 128  ;;  %p955_p7 = scmp.lt.s32.totalorder %s652_s13, %s652_s13 }
 0x2dd   : > { %p949_p2 = scmp.ne.s32.totalorder %s652_s13, %s948_s14  ;;  %p956_p9 = scmp.lt.s32.totalorder %s948_s14, %s948_s14 }
 0x2df   : > { %p950_p4 = pnand %p949_p2, %p1236_p1  ;;  %p957_p11 = por %p956_p9, %p955_p7 }
 0x2e1   : > { %p951_p6 = pneg %p950_p4 }
 0x2e3   : > { %p958_p13 = pnand %p957_p11, %p951_p6 }
 0x2e5   : > { %961 = shalt.err (!%p958_p13)
}
 0x2e6   : > { %s962_s21 = scalar_lea.hbm %s1284_s4, 128 }
 0x2e7   : > { %p963_p3 = scmp.ne.s32.totalorder %s1284_s4, %s962_s21  ;;  %p968_p10 = scmp.lt.u32.totalorder %s962_s21, %s1284_s4 }
 0x2e9   : > { %p964_p5 = pnand %p963_p3, %p1236_p1 }
 0x2eb   : > { %p965_p8 = pneg %p964_p5 }
 0x2ed   : > { %p970_p12 = pnand %p968_p10, %p965_p8 }
 0x2ef   : > { %973 = shalt.err (!%p970_p12)
}
 0x2f0   : > { %840 = dma.vmem_to_hbm [thread:$0]  (%p1236_p1), %s652_s13, 128, %s1284_s4, [#allocation6]  }
 0x2f1   : > { %1007 = dma.done.wait (%p1236_p1), [#allocation6], 128  }
 0x2f2   : > { %1009 = vsyncadd (%p1236_p1), [#allocation6], 4294967168 }
 0x2f3 PF: > { %s19_s20 = sadd.s32 1, %s1032_s20   ;;  %s1300_s15 = smov %s1016_s16 }
 0x2f4   : > { %p16_p0 = scmp.ge.s32.totalorder %s19_s20, 4   ;;  %s1301_s16 = smov %s1020_s17 }
 0x2f5   : > { %s1302_s17 = smov %s1134_s28  ;;  %s1303_s18 = smov %s1028_s19 }
 0x2f6   : > { %s1304_s19 = smov %s1306_s22  ;;  %18 = sbr.rel (!%p16_p0) target bundleno = 6 (0x6), region = 94 }
 0x2fd   :  { %664 = vsyncpa [#allocation5], 1 }
 0x2fe   :  { %666 = vsyncpa [#allocation5 + $0x1], 1 }
 0x2ff   :  { %667 = vsyncpa [#allocation8], 1 }
 0x300   :  { %668 = vsyncpa [#allocation6], 1 }
 0x301   :  { %670 = vsyncpa [#allocation6 + $0x1], 1 }

</bundles_post_ra>
